<compile_context>
chip_gen: v6e
topology: v6e:2x2x1
jax: 0.10.0
libtpu: 0.0.40
codegen_flags: <defaults>
</compile_context>

<pallas_src>
import functools

import jax
import jax.numpy as jnp
from jax.experimental import pallas as pl
from jax.experimental.pallas import tpu as pltpu

_MIB = 1024 * 1024


def _single_step_kernel(x_ref, w_ref, b_ref, o_ref, *, compute_dtype):
    # x_ref: (tm, D), w_ref: (D, tn), b_ref: (1, tn), o_ref: (tm, tn)
    acc = jnp.dot(
        x_ref[...].astype(compute_dtype),
        w_ref[...].astype(compute_dtype),
        preferred_element_type=jnp.float32,
    )
    o_ref[...] = (acc + b_ref[...].astype(jnp.float32)).astype(o_ref.dtype)


def _ksplit_kernel(x_ref, w_ref, b_ref, o_ref, acc_ref, *, compute_dtype):
    # x_ref: (tm, tk), w_ref: (tk, tn), b_ref: (1, tn), o_ref/acc_ref: (tm, tn)
    k = pl.program_id(2)

    @pl.when(k == 0)
    def _():
        # Bias folded into the accumulator init (no epilogue add).
        acc_ref[...] = jnp.broadcast_to(
            b_ref[...].astype(jnp.float32), acc_ref.shape
        )

    acc_ref[...] += jnp.dot(
        x_ref[...].astype(compute_dtype),
        w_ref[...].astype(compute_dtype),
        preferred_element_type=jnp.float32,
    )

    @pl.when(k == pl.num_programs(2) - 1)
    def _():
        o_ref[...] = acc_ref[...].astype(o_ref.dtype)


def first_sequence_element_head(
    x, w, b, *, compute_dtype=jnp.bfloat16, tm=None, tn=None, tk=None
):
    """x: (B, S, D), w: (D, H), b: (1, H) -> (B, H)  (== (x @ W + b)[:, 0, :])."""
    B, S, D = x.shape
    Dw, H = w.shape
    assert Dw == D and b.shape == (1, H)

    # Sequence position 0 is selected before the call: this touches only B*D
    # elements (tiny vs. the dominant D*H weight stream).  Weights are kept in
    # their stored dtype; the cast happens per-tile inside the kernel.
    x0 = x[:, 0, :]
    bf = b.astype(jnp.float32)

    x_it = jnp.dtype(x0.dtype).itemsize
    w_it = jnp.dtype(w.dtype).itemsize
    out_dtype = x.dtype
    o_it = jnp.dtype(out_dtype).itemsize

    # ----------------------------- tile selection ---------------------------
    if tm is None:
        tm = B if B <= 512 else 512            # multiple of 8 or == B
    if tn is None:
        if H <= 256:
            tn = H
        elif H < 512:
            tn = 256
        else:
            tn = 512
        # v7x: keep both TensorCores busy.  If the (M, N) grid would collapse
        # to a single program, split N (H=256 -> tn=128, H=512 -> tn=256, ...).
        if (pl.cdiv(B, tm) == 1 and pl.cdiv(H, tn) == 1
                and H >= 256 and H % 256 == 0):
            tn = H // 2
    if tn != H and tn % 128 != 0:
        tn = H                                  # stay lane-legal
    if tk is None:
        tk = D                                  # prefer: no K reduction grid
        # Split K only if double-buffered input tiles would not fit a safe
        # VMEM budget; keep tk a 128-multiple that divides D (no padded
        # garbage in the reduction) and the weight slab as fat as possible.
        budget = 28 * _MIB
        if 2 * (tm * tk * x_it + tk * tn * w_it) > budget:
            per_k_bytes = 2 * (tm * x_it + tn * w_it)
            cand = (budget // per_k_bytes) // 128 * 128
            while cand >= 128 and D % cand != 0:
                cand -= 128
            tk = int(cand) if cand >= 128 else D

    m_steps = pl.cdiv(B, tm)
    n_steps = pl.cdiv(H, tn)
    k_steps = pl.cdiv(D, tk)

    # --------------------------- VMEM / cost hints --------------------------
    vmem_need = (
        2 * tm * tk * x_it            # x tiles (double-buffered)
        + 2 * tk * tn * w_it          # w tiles (double-buffered)
        + 2 * tn * 4                  # bias tiles
        + 2 * tm * tn * o_it          # output tiles
        + (tm * tn * 4 if k_steps > 1 else 0)   # f32 accumulator scratch
    )
    vmem_limit = int(min(64 * _MIB, max(2 * vmem_need, 16 * _MIB)))

    cost = pl.CostEstimate(
        flops=2 * B * D * H,
        transcendentals=0,
        bytes_accessed=(
            n_steps * B * D * x_it    # x0 re-read once per N block
            + m_steps * D * H * w_it  # w re-read once per M block
            + m_steps * H * 4         # bias
            + B * H * o_it            # output
        ),
    )

    # ------------------------------ dispatch --------------------------------
    if k_steps == 1:
        kernel = functools.partial(_single_step_kernel,
                                   compute_dtype=compute_dtype)
        return pl.pallas_call(
            kernel,
            out_shape=jax.ShapeDtypeStruct((B, H), out_dtype),
            grid_spec=pltpu.PrefetchScalarGridSpec(
                num_scalar_prefetch=0,
                grid=(m_steps, n_steps),
                in_specs=[
                    pl.BlockSpec((tm, D), lambda i, j: (i, 0)),
                    pl.BlockSpec((D, tn), lambda i, j: (0, j)),
                    pl.BlockSpec((1, tn), lambda i, j: (0, j)),
                ],
                out_specs=pl.BlockSpec((tm, tn), lambda i, j: (i, j)),
            ),
            compiler_params=pltpu.CompilerParams(
                dimension_semantics=("parallel", "parallel"),
                vmem_limit_bytes=vmem_limit,
            ),
            cost_estimate=cost,
        )(x0, w, bf)

    kernel = functools.partial(_ksplit_kernel, compute_dtype=compute_dtype)
    return pl.pallas_call(
        kernel,
        out_shape=jax.ShapeDtypeStruct((B, H), out_dtype),
        grid_spec=pltpu.PrefetchScalarGridSpec(
            num_scalar_prefetch=0,
            grid=(m_steps, n_steps, k_steps),
            in_specs=[
                pl.BlockSpec((tm, tk), lambda i, j, k: (i, k)),
                pl.BlockSpec((tk, tn), lambda i, j, k: (k, j)),
                pl.BlockSpec((1, tn), lambda i, j, k: (0, j)),
            ],
            out_specs=pl.BlockSpec((tm, tn), lambda i, j, k: (i, j)),
            scratch_shapes=[pltpu.VMEM((tm, tn), jnp.float32)],
        ),
        compiler_params=pltpu.CompilerParams(
            dimension_semantics=("parallel", "parallel", "arbitrary"),
            vmem_limit_bytes=vmem_limit,
        ),
        cost_estimate=cost,
    )(x0, w, bf)


if __name__ == "__main__":
    key = jax.random.PRNGKey(0)

    def make_case(k, B, S, D, H):
        kx, kw, kb = jax.random.split(k, 3)
        x = jax.random.normal(kx, (B, S, D), dtype=jnp.float32)
        w = jax.random.normal(kw, (D, H), dtype=jnp.float32) * 0.05
        b = jax.random.normal(kb, (1, H), dtype=jnp.float32) * 0.05
        ref = jnp.einsum("bd,dh->bh", x[:, 0, :], w) + b
        return x, w, b, ref

    k1, k2 = jax.random.split(key)

    # Case 1: small shapes implied by the forward (batch=2, seq=8, hidden=32).
    x, w, b, ref = make_case(k1, B=2, S=8, D=32, H=32)

    out_f32 = first_sequence_element_head(x, w, b, compute_dtype=jnp.float32)
    out_f32 = jax.block_until_ready(out_f32)
    assert out_f32.shape == (2, 32)
    assert jnp.allclose(out_f32, ref, atol=2e-2, rtol=2e-2)

    out_bf16 = first_sequence_element_head(x, w, b)  # bf16 MXU operands
    out_bf16 = jax.block_until_ready(out_bf16)
    assert out_bf16.shape == (2, 32)
    assert jnp.allclose(out_bf16, ref, atol=3e-2, rtol=3e-2)

    # Case 2: moderately wider head (exercises tn=256, 2 N grid steps) and a
    # forced K-split (tk=128) to exercise the accumulator-variant kernel.
    x2, w2, b2, ref2 = make_case(k2, B=4, S=3, D=256, H=384)

    out2 = first_sequence_element_head(x2, w2, b2)
    out2 = jax.block_until_ready(out2)
    assert out2.shape == (4, 384)
    assert jnp.allclose(out2, ref2, atol=3e-2, rtol=3e-2)

    out2_split = first_sequence_element_head(
        x2, w2, b2, compute_dtype=jnp.float32, tk=128
    )
    out2_split = jax.block_until_ready(out2_split)
    assert out2_split.shape == (4, 384)
    assert jnp.allclose(out2_split, ref2, atol=2e-2, rtol=2e-2)

    print("KERNEL_OK")
</pallas_src>

<mosaic_0001>
module attributes {stable_mosaic.version = 11 : i64} {
  func.func @_single_step_kernel(%arg0: i32, %arg1: i32, %arg2: memref<2x32xf32, #tpu.memory_space<vmem>>, %arg3: memref<32x32xf32, #tpu.memory_space<vmem>>, %arg4: memref<1x32xf32, #tpu.memory_space<vmem>>, %arg5: memref<2x32xf32, #tpu.memory_space<vmem>>) attributes {dimension_semantics = [#tpu.dimension_semantics<parallel>, #tpu.dimension_semantics<parallel>], iteration_bounds = array<i64: 1, 1>, scalar_prefetch = 0 : i64, scratch_operands = 0 : i64, tpu.core_type = #tpu.core_type<tc>, window_params = [{transform_indices = @transform_0, window_bounds = array<i64: 2, 32>}, {transform_indices = @transform_1, window_bounds = array<i64: 32, 32>}, {transform_indices = @transform_2, window_bounds = array<i64: 1, 32>}, {transform_indices = @transform_3, window_bounds = array<i64: 2, 32>}]} {
    %c0 = arith.constant 0 : index
    %c0_0 = arith.constant 0 : index
    %0 = vector.load %arg2[%c0, %c0_0] : memref<2x32xf32, #tpu.memory_space<vmem>>, vector<2x32xf32>
    %c0_1 = arith.constant 0 : index
    %c0_2 = arith.constant 0 : index
    %1 = vector.load %arg3[%c0_1, %c0_2] : memref<32x32xf32, #tpu.memory_space<vmem>>, vector<32x32xf32>
    %cst = arith.constant dense<0.000000e+00> : vector<2x32xf32>
    %2 = tpu.matmul %0, %1, %cst {dimension_numbers = #tpu.dot_dimension_numbers<[1], [0], [0], [1], [0, 0, 1, 1], [], []>} : vector<2x32xf32>, vector<32x32xf32>, vector<2x32xf32> -> vector<2x32xf32>
    %c0_3 = arith.constant 0 : index
    %c0_4 = arith.constant 0 : index
    %3 = vector.load %arg4[%c0_3, %c0_4] : memref<1x32xf32, #tpu.memory_space<vmem>>, vector<1x32xf32>
    %4 = vector.broadcast %3 : vector<1x32xf32> to vector<2x32xf32>
    %5 = arith.addf %2, %4 : vector<2x32xf32>
    %c0_5 = arith.constant 0 : index
    %c0_6 = arith.constant 0 : index
    %6 = vector.load %arg5[%c0_5, %c0_6] : memref<2x32xf32, #tpu.memory_space<vmem>>, vector<2x32xf32>
    tpu.vector_store %arg5[%c0_5, %c0_6], %5 {strides = array<i32>} : memref<2x32xf32, #tpu.memory_space<vmem>>, vector<2x32xf32>,
    return
  }
  func.func @transform_0(%arg0: i32, %arg1: i32) -> (i32, i32) {
    %c0_i32 = arith.constant 0 : i32
    %c0_i32_0 = arith.constant 0 : i32
    return %arg0, %c0_i32 : i32, i32
  }
  func.func @transform_1(%arg0: i32, %arg1: i32) -> (i32, i32) {
    %c0_i32 = arith.constant 0 : i32
    %c0_i32_0 = arith.constant 0 : i32
    return %c0_i32, %arg1 : i32, i32
  }
  func.func @transform_2(%arg0: i32, %arg1: i32) -> (i32, i32) {
    %c0_i32 = arith.constant 0 : i32
    %c0_i32_0 = arith.constant 0 : i32
    return %c0_i32, %arg1 : i32, i32
  }
  func.func @transform_3(%arg0: i32, %arg1: i32) -> (i32, i32) {
    %c0_i32 = arith.constant 0 : i32
    return %arg0, %arg1 : i32, i32
  }
}

</mosaic_0001>

<bundles_post_ra>
// kernel: tpu_custom_call.1
= control target key start
LH: loop header
LB: loop body
LE: loop exit
PB: predicated region body
PF: predicated region fallthrough
CT: control target
= control target key end

     0   :  { %8 = vsyncpa [#allocation3], 0  ;;  %s275_s0 = inlined_call_operand.hbm [shape: f32[2,32], index: 0, kind: input, shape index: {}]   ;;  %s276_s1 = inlined_call_operand.hbm [shape: f32[32,32], index: 1, kind: input, shape index: {}]   ;;  %s277_s2 = inlined_call_operand.vmem [shape: f32[1,32], index: 2, kind: input, shape index: {}]   ;;  %s278_s3 = inlined_call_operand.hbm [shape: f32[2,32], index: 3, kind: output, shape index: {}]  }
   0x1   :  { %9 = vsyncpa [#allocation6], 0 }
   0x2   :  { %10 = vsyncpa [#allocation4], 0  ;;  %s236_s12 = smov [#allocation2]   ;;  %s237_s14 = smov [#allocation5]  }
   0x3   :  { %s17_s13 = sshll.u32 %s236_s12, 4  ;;  %s26_s15 = sshll.u32 %s237_s14, 4  ;;  %s18_s13 = int_to_ptr.vmem [resolvable:$true] %s17_s13  ;;  %s27_s15 = int_to_ptr.vmem [resolvable:$true] %s26_s15 }
   0x4   :  { %s178_s16 = scalar_lea.vmem %s18_s13, 32  ;;  %p183_p1 = scmp.lt.s32.totalorder %s18_s13, %s18_s13 }
   0x5   :  { %p179_p0 = scmp.ne.s32.totalorder %s18_s13, %s178_s16  ;;  %p184_p2 = scmp.lt.s32.totalorder %s178_s16, %s178_s16 }
   0x7   :  { %p185_p3 = por %p184_p2, %p183_p1 }
   0x9   :  { %p186_p4 = pnand %p185_p3, %p179_p0 }
   0xb   :  { %189 = shalt.err (!%p186_p4)
}
   0xc   :  { %20 = dma.hbm_to_vmem [thread:$0]  %s275_s0, 32, %s18_s13, [#allocation3]  }
   0xd   :  { %s198_s19 = scalar_lea.vmem %s27_s15, 512  ;;  %p203_p6 = scmp.lt.s32.totalorder %s27_s15, %s27_s15 }
   0xe   :  { %p199_p5 = scmp.ne.s32.totalorder %s27_s15, %s198_s19  ;;  %p204_p7 = scmp.lt.s32.totalorder %s198_s19, %s198_s19 }
  0x10   :  { %p205_p8 = por %p204_p7, %p203_p6 }
  0x12   :  { %p206_p9 = pnand %p205_p8, %p199_p5 }
  0x14   :  { %209 = shalt.err (!%p206_p9)
}
  0x15   :  { %s238_s20 = smov 128   ;;  %s239_s21 = smov 8  }
  0x16   :  { %32 = dma.hbm_to_vmem [thread:$0]  %s276_s1, 512, %s27_s15, [#allocation6], %s238_s20, %s238_s20, %s239_s21  }
  0x17   :  { %230 = dma.done.wait [#allocation3], 32  }
  0x18   :  { %231 = vsyncadd [#allocation3], 4294967264 }
  0x19   :  { %232 = dma.done.wait [#allocation6], 512  }
  0x1a   :  { %233 = vsyncadd [#allocation6], 4294966784  ;;  %v240_v0 = vmov 0.0   ;;  %vm241_vm0 = vmmov 0   ;;  %v45_v1 = vld [vmem:[#allocation5 + $0x18] sm:$0xff]  ;;  %v44_v2 = vld [vmem:[#allocation5 + $0x10] sm:$0xff] }
  0x1b   :  { %152 = vmatprep.subr.mxu0 %v240_v0  ;;  %160 = vmatprep.mubr.msk.f32.mxu0 %vm241_vm0, %v240_v0  ;;  %v43_v3 = vld [vmem:[#allocation5 + $0x8] sm:$0xff]  ;;  %v42_v4 = vld [vmem:[#allocation5] sm:$0xff]  ;;  %v41_v5 = vld [vmem:[#allocation2] sm:$0x3]  ;;  %vm53_vm1 = vcmask 261120   ;;  %s242_s24 = smov [#allocation7]  }
  0x1c   :  { %153 = vmatpush3.msra.mxu0 %v45_v1  ;;  %v145_v6 = vld [vmem:[%s277_s2] ss:$0 sm:$0xff]  ;;  %s135_s25 = sshll.u32 %s242_s24, 4  ;;  %vm127_vm2 = vcmask 254976   ;;  %s136_s25 = int_to_ptr.vmem [resolvable:$true] %s135_s25 }
  0x1d   :  { %154 = vmatprep.subr.mxu0 %v240_v0  ;;  %s210_s26 = scalar_lea.vmem %s136_s25, 32  ;;  %p215_p11 = scmp.lt.s32.totalorder %s136_s25, %s136_s25 }
  0x1e   :  { %155 = vmatpush3.msra.mxu0 %v44_v2  ;;  %p211_p10 = scmp.ne.s32.totalorder %s136_s25, %s210_s26  ;;  %p216_p12 = scmp.lt.s32.totalorder %s210_s26, %s210_s26 }
  0x1f   :  { %156 = vmatprep.subr.mxu0 %v240_v0 }
  0x20   :  { %157 = vmatpush3.msra.mxu0 %v43_v3  ;;  %p217_p13 = por %p216_p12, %p215_p11 }
  0x21   :  { %158 = vmatprep.subr.mxu0 %v240_v0 }
  0x22   :  { %159 = vmatpush3.msra.mxu0 %v42_v4  ;;  %p218_p0 = pnand %p217_p13, %p211_p10 }
  0x23   :  { %161 = vmatmul.mubr.msk.f32.vlgmr.msra.gmra.mxu0 %vm53_vm1, %v41_v5 }
  0xe3   :  { %v123_v7 = vpop.f32.mrf.mxu0 }
  0xe4   :  { %v124_v8 = vadd.f32 %v145_v6, %v123_v7 }
  0xe5   :  { %v162_v9 = vpop.f32.mrf.mxu0 }
  0xe6   :  { %128 = vst.msk [vmem:[#allocation7] sm:$0x3] %vm127_vm2, %v124_v8 }
  0xe7   :  { %221 = shalt.err (!%p218_p0)
}
  0xe8   :  { %138 = dma.vmem_to_hbm [thread:$0]  %s136_s25, 32, %s278_s3, [#allocation4]  }
  0xe9   :  { %234 = dma.done.wait [#allocation4], 32  }
  0xea   :  { %235 = vsyncadd [#allocation4], 4294967264 }
  0xeb   :  { %142 = vsyncpa [#allocation3], 1 }
  0xec   :  { %143 = vsyncpa [#allocation6], 1 }
  0xed   :  { %144 = vsyncpa [#allocation4], 1 }

</bundles_post_ra>
